<compile_context>
chip_gen: v7x
topology: tpu7x:2x2x1
jax: 0.10.0
libtpu: 0.0.40
codegen_flags: <defaults>
</compile_context>

<pallas_src>
import math
import functools

import jax
import jax.numpy as jnp
from jax import lax
from jax.experimental import pallas as pl
from jax.experimental.pallas import tpu as pltpu


# ----------------------------- tiling helpers ------------------------------ #

def _pick_tile(dim, target, aligns=(128, 8)):
    """Largest tile <= target that divides `dim`, preferring the coarsest
    alignment in `aligns`; falls back to the full dim (always a legal block)."""
    if dim <= target:
        return dim
    for a in aligns:
        t = (target // a) * a
        while t >= a:
            if dim % t == 0:
                return t
            t -= a
    return dim


_MM_PARAMS = pltpu.CompilerParams(
    dimension_semantics=("parallel", "parallel", "arbitrary"),
    vmem_limit_bytes=64 * 1024 * 1024)


# ------------- fused RMSNorm -> matmul (+ optional bias) kernel ------------- #

def _norm_matmul_kernel(*refs, has_bias, k_dim, eps):
    if has_bias:
        nw_ref, x_ref, w_ref, b_ref, o_ref, acc_ref, ssq_ref = refs
    else:
        nw_ref, x_ref, w_ref, o_ref, acc_ref, ssq_ref = refs
        b_ref = None

    @pl.when(pl.program_id(2) == 0)
    def _():
        acc_ref[...] = jnp.zeros_like(acc_ref)
        ssq_ref[...] = jnp.zeros_like(ssq_ref)

    x = x_ref[...]                                             # f32 residual tile
    ssq_ref[...] += jnp.sum(x * x, axis=-1, keepdims=True)     # RMS stats (XLU)
    xn = (x * nw_ref[...]).astype(jnp.bfloat16)                # per-col norm weight
    acc_ref[...] += jnp.dot(xn, w_ref[...],                    # bf16 weights
                            preferred_element_type=jnp.float32)

    @pl.when(pl.program_id(2) == pl.num_programs(2) - 1)
    def _():
        scale = lax.rsqrt(ssq_ref[...] * (1.0 / k_dim) + eps)  # per-row rsqrt
        out = acc_ref[...] * scale                             # commutes with x@W
        if has_bias:
            out = out + b_ref[...]
        o_ref[...] = out.astype(o_ref.dtype)


def norm_matmul(x, norm_w, w, b=None, *, eps=1e-6, out_dtype=jnp.float32,
                tm=512, tn=512, tk=512):
    """y = (RMSNorm(x; norm_w) @ w) [+ b], RMS stats fused into the matmul."""
    M, K = x.shape
    n_out = w.shape[1]
    pad = (-n_out) % 128                    # lane-dense output blocks (odd vocab)
    if pad:
        w = jnp.pad(w, ((0, 0), (0, pad)))
        if b is not None:
            b = jnp.pad(b, (0, pad))
    N = n_out + pad
    tm = _pick_tile(M, tm)
    tn = _pick_tile(N, tn, (128,))
    tk = _pick_tile(K, tk, (128,))
    has_bias = b is not None

    in_specs = [
        pl.BlockSpec((1, tk), lambda i, j, k: (0, k)),    # RMSNorm weight
        pl.BlockSpec((tm, tk), lambda i, j, k: (i, k)),   # x (f32)
        pl.BlockSpec((tk, tn), lambda i, j, k: (k, j)),   # w (bf16)
    ]
    args = [norm_w.reshape(1, K), x, w]
    if has_bias:
        in_specs.append(pl.BlockSpec((1, tn), lambda i, j, k: (0, j)))
        args.append(b.reshape(1, N))

    out = pl.pallas_call(
        functools.partial(_norm_matmul_kernel, has_bias=has_bias,
                          k_dim=K, eps=eps),
        out_shape=jax.ShapeDtypeStruct((M, N), out_dtype),
        grid=(M // tm, N // tn, K // tk),
        in_specs=in_specs,
        out_specs=pl.BlockSpec((tm, tn), lambda i, j, k: (i, j)),
        scratch_shapes=[pltpu.VMEM((tm, tn), jnp.float32),
                        pltpu.VMEM((tm, 1), jnp.float32)],
        compiler_params=_MM_PARAMS,
    )(*args)
    return out[:, :n_out] if pad else out


# ------------------- matmul + bias + residual epilogue ---------------------- #

def _matmul_bias_res_kernel(x_ref, w_ref, b_ref, r_ref, o_ref, acc_ref):
    @pl.when(pl.program_id(2) == 0)
    def _():
        acc_ref[...] = jnp.zeros_like(acc_ref)

    acc_ref[...] += jnp.dot(x_ref[...].astype(jnp.bfloat16), w_ref[...],
                            preferred_element_type=jnp.float32)

    @pl.when(pl.program_id(2) == pl.num_programs(2) - 1)
    def _():
        o_ref[...] = (acc_ref[...] + b_ref[...] + r_ref[...]).astype(o_ref.dtype)


def matmul_bias_residual(x, w, b, res, *, tm=512, tn=512, tk=512):
    """y = res + x @ w + b (residual & bias fused as epilogue; x/w bf16)."""
    M, K = x.shape
    N = w.shape[1]
    tm = _pick_tile(M, tm)
    tn = _pick_tile(N, tn, (128, 8))
    tk = _pick_tile(K, tk, (128, 8))
    return pl.pallas_call(
        _matmul_bias_res_kernel,
        out_shape=jax.ShapeDtypeStruct((M, N), jnp.float32),
        grid=(M // tm, N // tn, K // tk),
        in_specs=[
            pl.BlockSpec((tm, tk), lambda i, j, k: (i, k)),
            pl.BlockSpec((tk, tn), lambda i, j, k: (k, j)),
            pl.BlockSpec((1, tn), lambda i, j, k: (0, j)),
            pl.BlockSpec((tm, tn), lambda i, j, k: (i, j)),
        ],
        out_specs=pl.BlockSpec((tm, tn), lambda i, j, k: (i, j)),
        scratch_shapes=[pltpu.VMEM((tm, tn), jnp.float32)],
        compiler_params=_MM_PARAMS,
    )(x, w, b.reshape(1, N), res)


# --------------- fused RMSNorm -> dual matmul -> SwiGLU gate ---------------- #

def _norm_swiglu_kernel(nw_ref, x_ref, wu_ref, wv_ref, bu_ref, bv_ref,
                        o_ref, accu_ref, accv_ref, ssq_ref, *, k_dim, eps):
    @pl.when(pl.program_id(2) == 0)
    def _():
        accu_ref[...] = jnp.zeros_like(accu_ref)
        accv_ref[...] = jnp.zeros_like(accv_ref)
        ssq_ref[...] = jnp.zeros_like(ssq_ref)

    x = x_ref[...]
    ssq_ref[...] += jnp.sum(x * x, axis=-1, keepdims=True)
    xn = (x * nw_ref[...]).astype(jnp.bfloat16)
    accu_ref[...] += jnp.dot(xn, wu_ref[...], preferred_element_type=jnp.float32)
    accv_ref[...] += jnp.dot(xn, wv_ref[...], preferred_element_type=jnp.float32)

    @pl.when(pl.program_id(2) == pl.num_programs(2) - 1)
    def _():
        scale = lax.rsqrt(ssq_ref[...] * (1.0 / k_dim) + eps)
        u = accu_ref[...] * scale + bu_ref[...]
        v = accv_ref[...] * scale + bv_ref[...]
        o_ref[...] = (u * jax.nn.sigmoid(v)).astype(o_ref.dtype)


def norm_swiglu(x, norm_w, wu, wv, bu, bv, *, eps=1e-6, tm=512, tn=512, tk=512):
    """g = (xn @ wu + bu) * sigmoid(xn @ wv + bv), xn = RMSNorm(x; norm_w)."""
    M, K = x.shape
    N = wu.shape[1]
    tm = _pick_tile(M, tm)
    tn = _pick_tile(N, tn, (128, 8))
    tk = _pick_tile(K, tk, (128, 8))
    return pl.pallas_call(
        functools.partial(_norm_swiglu_kernel, k_dim=K, eps=eps),
        out_shape=jax.ShapeDtypeStruct((M, N), jnp.bfloat16),
        grid=(M // tm, N // tn, K // tk),
        in_specs=[
            pl.BlockSpec((1, tk), lambda i, j, k: (0, k)),
            pl.BlockSpec((tm, tk), lambda i, j, k: (i, k)),
            pl.BlockSpec((tk, tn), lambda i, j, k: (k, j)),
            pl.BlockSpec((tk, tn), lambda i, j, k: (k, j)),
            pl.BlockSpec((1, tn), lambda i, j, k: (0, j)),
            pl.BlockSpec((1, tn), lambda i, j, k: (0, j)),
        ],
        out_specs=pl.BlockSpec((tm, tn), lambda i, j, k: (i, j)),
        scratch_shapes=[pltpu.VMEM((tm, tn), jnp.float32),
                        pltpu.VMEM((tm, tn), jnp.float32),
                        pltpu.VMEM((tm, 1), jnp.float32)],
        compiler_params=_MM_PARAMS,
    )(norm_w.reshape(1, K), x, wu, wv, bu.reshape(1, N), bv.reshape(1, N))


# ------------------ flash-style causal attention (+ fused RoPE) ------------- #

def _flash_attn_kernel(q_ref, k_ref, v_ref, sq_ref, cq_ref, sk_ref, ck_ref,
                       o_ref, m_sc, l_sc, acc_sc, qrot_sc, *, scale, half):
    qi = pl.program_id(1)
    ki = pl.program_id(2)
    tq = q_ref.shape[1]
    tkv = k_ref.shape[1]

    @pl.when(ki == 0)
    def _():
        m_sc[...] = jnp.full_like(m_sc, -jnp.inf)
        l_sc[...] = jnp.zeros_like(l_sc)
        acc_sc[...] = jnp.zeros_like(acc_sc)
        # RoPE(Q) * 1/sqrt(dh): once per Q tile, not per KV step.  The +-1 sign
        # of rotate_half is folded into sq_ref, so only a lane roll is needed.
        q = q_ref[0].astype(jnp.float32)
        qr = q * cq_ref[...] + pltpu.roll(q, half, axis=1) * sq_ref[...]
        qrot_sc[...] = (qr * scale).astype(jnp.bfloat16)

    def attend(masked):
        k = k_ref[0].astype(jnp.float32)
        kr = (k * ck_ref[...] + pltpu.roll(k, half, axis=1) * sk_ref[...]
              ).astype(jnp.bfloat16)
        s = lax.dot_general(qrot_sc[...], kr, (((1,), (1,)), ((), ())),
                            preferred_element_type=jnp.float32)
        if masked:  # only on diagonal tiles
            row = qi * tq + lax.broadcasted_iota(jnp.int32, (tq, tkv), 0)
            col = ki * tkv + lax.broadcasted_iota(jnp.int32, (tq, tkv), 1)
            s = jnp.where(col > row, jnp.float32(-10000.0), s)  # reference fill
        m_prev = m_sc[...]
        m_new = jnp.maximum(m_prev, jnp.max(s, axis=-1, keepdims=True))
        alpha = jnp.exp(m_prev - m_new)
        p = jnp.exp(s - m_new)
        l_sc[...] = alpha * l_sc[...] + jnp.sum(p, axis=-1, keepdims=True)
        acc_sc[...] = alpha * acc_sc[...] + jnp.dot(
            p.astype(jnp.bfloat16), v_ref[0], preferred_element_type=jnp.float32)
        m_sc[...] = m_new

    fully_past = ki * tkv + (tkv - 1) <= qi * tq            # no masking needed
    needed = ki * tkv <= qi * tq + (tq - 1)                 # not entirely future

    @pl.when(fully_past)
    def _():
        attend(False)

    @pl.when(jnp.logical_not(fully_past) & needed)
    def _():
        attend(True)

    @pl.when(ki == pl.num_programs(2) - 1)
    def _():
        o_ref[0] = (acc_sc[...] * pl.reciprocal(l_sc[...], approx=True)
                    ).astype(o_ref.dtype)


def flash_attention(q, k, v, sin_signed, cos, scale, *, tq=128, tkv=128):
    """q,k,v: [B*H, T, dh] bf16 (pre-RoPE); causal softmax(q k^T * scale) @ v."""
    BH, T, dh = q.shape
    tq = _pick_tile(T, tq, (8,))
    tkv = _pick_tile(T, tkv, (8,))
    half = dh // 2

    def kv_block(b, i, j):
        # Clamp to the last causally-needed KV tile: future tiles are neither
        # computed nor DMA'd (block index stops changing -> no refetch).
        return (b, jnp.minimum(j, (i * tq + tq - 1) // tkv), 0)

    def trig_k_block(b, i, j):
        return (jnp.minimum(j, (i * tq + tq - 1) // tkv), 0)

    return pl.pallas_call(
        functools.partial(_flash_attn_kernel, scale=scale, half=half),
        out_shape=jax.ShapeDtypeStruct((BH, T, dh), jnp.bfloat16),
        grid=(BH, T // tq, T // tkv),
        in_specs=[
            pl.BlockSpec((1, tq, dh), lambda b, i, j: (b, i, 0)),
            pl.BlockSpec((1, tkv, dh), kv_block),
            pl.BlockSpec((1, tkv, dh), kv_block),
            pl.BlockSpec((tq, dh), lambda b, i, j: (i, 0)),     # signed sin (Q)
            pl.BlockSpec((tq, dh), lambda b, i, j: (i, 0)),     # cos       (Q)
            pl.BlockSpec((tkv, dh), trig_k_block),              # signed sin (K)
            pl.BlockSpec((tkv, dh), trig_k_block),              # cos       (K)
        ],
        out_specs=pl.BlockSpec((1, tq, dh), lambda b, i, j: (b, i, 0)),
        scratch_shapes=[pltpu.VMEM((tq, 1), jnp.float32),
                        pltpu.VMEM((tq, 1), jnp.float32),
                        pltpu.VMEM((tq, dh), jnp.float32),
                        pltpu.VMEM((tq, dh), jnp.bfloat16)],
        compiler_params=pltpu.CompilerParams(
            dimension_semantics=("parallel", "parallel", "arbitrary")),
    )(q, k, v, sin_signed, cos, sin_signed, cos)


# ----------------------------- JAX glue ------------------------------------- #

def sincos_tables(t, dim, base=10000.0):
    """Reference sincos (repeat_interleave'd), with rotate_half's +-1 sign
    folded into the sin table so the kernel only needs a lane roll."""
    pos = jnp.arange(t, dtype=jnp.float32)[:, None]
    inv = 1.0 / base ** (jnp.arange(0, dim, 2, dtype=jnp.float32) / dim)
    ang = pos * inv                                   # [t, dim/2]
    sin = jnp.repeat(jnp.sin(ang), 2, axis=-1)        # repeat_interleave(2, -1)
    cos = jnp.repeat(jnp.cos(ang), 2, axis=-1)
    half = dim // 2
    sign = jnp.where(jnp.arange(dim) < half, -1.0, 1.0)
    return sin * sign, cos


def attn_block(h, blk, B, T, D, H, sin_s, cos):
    """x + Attn(RMSNorm(x)); norm stats / bias / residual fused into matmuls."""
    M = B * T
    dh = D // H
    hf = h.reshape(M, D)
    qkv = norm_matmul(hf, blk["n1_w"], blk["qkv_w"], blk["qkv_b"],
                      out_dtype=jnp.bfloat16)                        # [M,3D] bf16
    qkv = qkv.reshape(B, T, 3, H, dh).transpose(2, 0, 3, 1, 4)       # [3,B,H,T,dh]
    q = qkv[0].reshape(B * H, T, dh)
    k = qkv[1].reshape(B * H, T, dh)
    v = qkv[2].reshape(B * H, T, dh)
    o = flash_attention(q, k, v, sin_s, cos, 1.0 / math.sqrt(dh))    # bf16
    o = o.reshape(B, H, T, dh).transpose(0, 2, 1, 3).reshape(M, D)
    return matmul_bias_residual(o, blk["o_w"], blk["o_b"], hf).reshape(B, T, D)


def ff_block(h, blk, B, T, D):
    """x + SwiGLU(RMSNorm(x)); norm / bias / gate / residual fused."""
    M = B * T
    hf = h.reshape(M, D)
    g = norm_swiglu(hf, blk["n2_w"], blk["u_w"], blk["v_w"],
                    blk["u_b"], blk["v_b"])                          # [M,dff] bf16
    return matmul_bias_residual(g, blk["out_w"], blk["out_b"], hf).reshape(B, T, D)


def gpt_forward(tokens, params):
    B, T = tokens.shape
    D = params["tok"].shape[1]
    H = params["n_heads"]
    dh = D // H
    h = jnp.take(params["tok"], tokens, axis=0)        # embedding lookup [B,T,D]
    sin_s, cos = sincos_tables(T, dh)
    for blk in params["blocks"]:
        h = attn_block(h, blk, B, T, D, H, sin_s, cos)
        h = ff_block(h, blk, B, T, D)
    hf = h.reshape(B * T, D)
    logits = norm_matmul(hf, params["norm_w"], params["head_w"],
                         out_dtype=jnp.float32)        # bias-less LM head
    return logits.reshape(B, T, -1)


# ----------------------------- parameters ----------------------------------- #

def init_params(key, V, D, n_layers, H, m=4):
    """Raw f32 parameters, mirroring the PyTorch module's layout."""
    def dense(k, i, o):
        return jax.random.normal(k, (i, o), jnp.float32) * 0.02

    keys = iter(jax.random.split(key, 2 + n_layers * 6))
    params = {
        "tok": jax.random.normal(next(keys), (V, D), jnp.float32) * 0.02,
        "n_heads": H,
        "norm_w": jnp.ones((D,), jnp.float32),
        "head_w": jax.random.normal(next(keys), (D, V), jnp.float32) * 0.02,
        "blocks": [],
    }
    dff = D * m
    for _ in range(n_layers):
        params["blocks"].append({
            "n1_w": jnp.ones((D,), jnp.float32),
            "n2_w": jnp.ones((D,), jnp.float32),
            "q_w": dense(next(keys), D, D), "q_b": jnp.zeros((D,), jnp.float32),
            "k_w": dense(next(keys), D, D), "k_b": jnp.zeros((D,), jnp.float32),
            "v_w": dense(next(keys), D, D), "v_b": jnp.zeros((D,), jnp.float32),
            "o_w": dense(next(keys), D, D), "o_b": jnp.zeros((D,), jnp.float32),
            "lin_w": dense(next(keys), D, 2 * dff),
            "lin_b": jnp.zeros((2 * dff,), jnp.float32),
            "out_w": dense(next(keys), dff, D),
            "out_b": jnp.zeros((D,), jnp.float32),
        })
    return params


def prepare_params(params):
    """Inference-ready params: QKV weights concatenated, all matmul weights
    pre-cast to bf16 (streamed straight into the MXU); norms / biases / the
    embedding stay f32."""
    bf16 = lambda a: a.astype(jnp.bfloat16)
    prepped = {
        "tok": params["tok"],
        "n_heads": params["n_heads"],
        "norm_w": params["norm_w"],
        "head_w": bf16(params["head_w"]),
        "blocks": [],
    }
    for blk in params["blocks"]:
        dff = blk["out_w"].shape[0]
        prepped["blocks"].append({
            "n1_w": blk["n1_w"], "n2_w": blk["n2_w"],
            "qkv_w": bf16(jnp.concatenate([blk["q_w"], blk["k_w"], blk["v_w"]], 1)),
            "qkv_b": jnp.concatenate([blk["q_b"], blk["k_b"], blk["v_b"]], 0),
            "o_w": bf16(blk["o_w"]), "o_b": blk["o_b"],
            "u_w": bf16(blk["lin_w"][:, :dff]), "v_w": bf16(blk["lin_w"][:, dff:]),
            "u_b": blk["lin_b"][:dff], "v_b": blk["lin_b"][dff:],
            "out_w": bf16(blk["out_w"]), "out_b": blk["out_b"],
        })
    return prepped


# ------------------------------------ main ---------------------------------- #

if __name__ == "__main__":
    # Small but tiling-friendly shapes: dh = D/H = 128, all matmul dims 128-aligned.
    V, D, H, N_LAYERS, B, T = 128, 256, 2, 2, 2, 32
    key = jax.random.PRNGKey(0)
    kp, kx = jax.random.split(key)
    params = prepare_params(init_params(kp, V, D, N_LAYERS, H))
    tokens = jax.random.randint(kx, (B, T), 0, V, dtype=jnp.int32)

    logits = gpt_forward(tokens, params)
    logits = jax.block_until_ready(logits)

    assert logits.shape == (B, T, V), logits.shape
    assert bool(jnp.all(jnp.isfinite(logits)))
    print("KERNEL_OK")
</pallas_src>

<mosaic_0001>
module attributes {stable_mosaic.version = 11 : i64} {
  func.func @_norm_matmul_kernel(%arg0: i32, %arg1: i32, %arg2: i32, %arg3: memref<1x256xf32, #tpu.memory_space<vmem>>, %arg4: memref<64x256xf32, #tpu.memory_space<vmem>>, %arg5: memref<256x384xbf16, #tpu.memory_space<vmem>>, %arg6: memref<1x384xf32, #tpu.memory_space<vmem>>, %arg7: memref<64x384xbf16, #tpu.memory_space<vmem>>, %arg8: memref<64x384xf32, #tpu.memory_space<vmem>>, %arg9: memref<64x1xf32, #tpu.memory_space<vmem>>) attributes {dimension_semantics = [#tpu.dimension_semantics<parallel>, #tpu.dimension_semantics<parallel>, #tpu.dimension_semantics<arbitrary>], iteration_bounds = array<i64: 1, 2, 1>, scalar_prefetch = 0 : i64, scratch_operands = 2 : i64, tpu.core_type = #tpu.core_type<tc>, window_params = [{transform_indices = @transform_0, window_bounds = array<i64: 1, 256>}, {transform_indices = @transform_1, window_bounds = array<i64: 64, 256>}, {transform_indices = @transform_2, window_bounds = array<i64: 256, 384>}, {transform_indices = @transform_3, window_bounds = array<i64: 1, 384>}, {transform_indices = @transform_4, window_bounds = array<i64: 64, 384>}]} {
    %c0_i32 = arith.constant 0 : i32
    %0 = arith.cmpi eq, %arg2, %c0_i32 : i32
    %1 = arith.extui %0 : i1 to i32
    %c0_i32_0 = arith.constant 0 : i32
    %2 = arith.cmpi ne, %1, %c0_i32_0 : i32
    scf.if %2 {
      %cst_17 = arith.constant 0.000000e+00 : f32
      %22 = vector.broadcast %cst_17 : f32 to vector<64x384xf32>
      %c0_18 = arith.constant 0 : index
      %c0_19 = arith.constant 0 : index
      %23 = vector.load %arg8[%c0_18, %c0_19] : memref<64x384xf32, #tpu.memory_space<vmem>>, vector<64x384xf32>
      tpu.vector_store %arg8[%c0_18, %c0_19], %22 {strides = array<i32>} : memref<64x384xf32, #tpu.memory_space<vmem>>, vector<64x384xf32>,
      %cst_20 = arith.constant 0.000000e+00 : f32
      %24 = vector.broadcast %cst_20 : f32 to vector<64x1xf32>
      %c0_21 = arith.constant 0 : index
      %c0_22 = arith.constant 0 : index
      %25 = vector.load %arg9[%c0_21, %c0_22] : memref<64x1xf32, #tpu.memory_space<vmem>>, vector<64x1xf32>
      tpu.vector_store %arg9[%c0_21, %c0_22], %24 {strides = array<i32>} : memref<64x1xf32, #tpu.memory_space<vmem>>, vector<64x1xf32>,
    } else {
    }
    %c0 = arith.constant 0 : index
    %c0_1 = arith.constant 0 : index
    %3 = vector.load %arg4[%c0, %c0_1] : memref<64x256xf32, #tpu.memory_space<vmem>>, vector<64x256xf32>
    %c0_2 = arith.constant 0 : index
    %c0_3 = arith.constant 0 : index
    %4 = vector.load %arg9[%c0_2, %c0_3] : memref<64x1xf32, #tpu.memory_space<vmem>>, vector<64x1xf32>
    %5 = arith.mulf %3, %3 : vector<64x256xf32>
    %cst = arith.constant dense<0.000000e+00> : vector<64xf32>
    %6 = vector.multi_reduction <add>, %5, %cst [1] : vector<64x256xf32> to vector<64xf32>
    %7 = vector.shape_cast %6 : vector<64xf32> to vector<64x1xf32>
    %8 = arith.addf %4, %7 : vector<64x1xf32>
    %c0_4 = arith.constant 0 : index
    %c0_5 = arith.constant 0 : index
    %9 = vector.load %arg9[%c0_4, %c0_5] : memref<64x1xf32, #tpu.memory_space<vmem>>, vector<64x1xf32>
    tpu.vector_store %arg9[%c0_4, %c0_5], %8 {strides = array<i32>} : memref<64x1xf32, #tpu.memory_space<vmem>>, vector<64x1xf32>,
    %c0_6 = arith.constant 0 : index
    %c0_7 = arith.constant 0 : index
    %10 = vector.load %arg3[%c0_6, %c0_7] : memref<1x256xf32, #tpu.memory_space<vmem>>, vector<1x256xf32>
    %11 = vector.broadcast %10 : vector<1x256xf32> to vector<64x256xf32>
    %12 = arith.mulf %3, %11 : vector<64x256xf32>
    %13 = arith.truncf %12 : vector<64x256xf32> to vector<64x256xbf16>
    %c0_8 = arith.constant 0 : index
    %c0_9 = arith.constant 0 : index
    %14 = vector.load %arg8[%c0_8, %c0_9] : memref<64x384xf32, #tpu.memory_space<vmem>>, vector<64x384xf32>
    %c0_10 = arith.constant 0 : index
    %c0_11 = arith.constant 0 : index
    %15 = vector.load %arg5[%c0_10, %c0_11] : memref<256x384xbf16, #tpu.memory_space<vmem>>, vector<256x384xbf16>
    %cst_12 = arith.constant dense<0.000000e+00> : vector<64x384xf32>
    %16 = tpu.matmul %13, %15, %cst_12 {dimension_numbers = #tpu.dot_dimension_numbers<[1], [0], [0], [1], [0, 0, 1, 1], [], []>} : vector<64x256xbf16>, vector<256x384xbf16>, vector<64x384xf32> -> vector<64x384xf32>
    %17 = arith.addf %14, %16 : vector<64x384xf32>
    %c0_13 = arith.constant 0 : index
    %c0_14 = arith.constant 0 : index
    %18 = vector.load %arg8[%c0_13, %c0_14] : memref<64x384xf32, #tpu.memory_space<vmem>>, vector<64x384xf32>
    tpu.vector_store %arg8[%c0_13, %c0_14], %17 {strides = array<i32>} : memref<64x384xf32, #tpu.memory_space<vmem>>, vector<64x384xf32>,
    %c0_i32_15 = arith.constant 0 : i32
    %19 = arith.cmpi eq, %arg2, %c0_i32_15 : i32
    %20 = arith.extui %19 : i1 to i32
    %c0_i32_16 = arith.constant 0 : i32
    %21 = arith.cmpi ne, %20, %c0_i32_16 : i32
    scf.if %21 {
      %c0_17 = arith.constant 0 : index
      %c0_18 = arith.constant 0 : index
      %22 = vector.load %arg9[%c0_17, %c0_18] : memref<64x1xf32, #tpu.memory_space<vmem>>, vector<64x1xf32>
      %cst_19 = arith.constant 3.906250e-03 : f32
      %23 = vector.broadcast %cst_19 : f32 to vector<64x1xf32>
      %24 = arith.mulf %22, %23 : vector<64x1xf32>
      %cst_20 = arith.constant 9.99999997E-7 : f32
      %25 = vector.broadcast %cst_20 : f32 to vector<64x1xf32>
      %26 = arith.addf %24, %25 : vector<64x1xf32>
      %27 = math.rsqrt %26 : vector<64x1xf32>
      %c0_21 = arith.constant 0 : index
      %c0_22 = arith.constant 0 : index
      %28 = vector.load %arg8[%c0_21, %c0_22] : memref<64x384xf32, #tpu.memory_space<vmem>>, vector<64x384xf32>
      %29 = vector.broadcast %27 : vector<64x1xf32> to vector<64x384xf32>
      %30 = arith.mulf %28, %29 : vector<64x384xf32>
      %c0_23 = arith.constant 0 : index
      %c0_24 = arith.constant 0 : index
      %31 = vector.load %arg6[%c0_23, %c0_24] : memref<1x384xf32, #tpu.memory_space<vmem>>, vector<1x384xf32>
      %32 = vector.broadcast %31 : vector<1x384xf32> to vector<64x384xf32>
      %33 = arith.addf %30, %32 : vector<64x384xf32>
      %34 = arith.truncf %33 : vector<64x384xf32> to vector<64x384xbf16>
      %c0_25 = arith.constant 0 : index
      %c0_26 = arith.constant 0 : index
      %35 = vector.load %arg7[%c0_25, %c0_26] : memref<64x384xbf16, #tpu.memory_space<vmem>>, vector<64x384xbf16>
      tpu.vector_store %arg7[%c0_25, %c0_26], %34 {strides = array<i32>} : memref<64x384xbf16, #tpu.memory_space<vmem>>, vector<64x384xbf16>,
    } else {
    }
    return
  }
  func.func @transform_0(%arg0: i32, %arg1: i32, %arg2: i32) -> (i32, i32) {
    %c0_i32 = arith.constant 0 : i32
    %c0_i32_0 = arith.constant 0 : i32
    return %c0_i32, %arg2 : i32, i32
  }
  func.func @transform_1(%arg0: i32, %arg1: i32, %arg2: i32) -> (i32, i32) {
    %c0_i32 = arith.constant 0 : i32
    return %arg0, %arg2 : i32, i32
  }
  func.func @transform_2(%arg0: i32, %arg1: i32, %arg2: i32) -> (i32, i32) {
    %c0_i32 = arith.constant 0 : i32
    return %arg2, %arg1 : i32, i32
  }
  func.func @transform_3(%arg0: i32, %arg1: i32, %arg2: i32) -> (i32, i32) {
    %c0_i32 = arith.constant 0 : i32
    %c0_i32_0 = arith.constant 0 : i32
    return %c0_i32, %arg1 : i32, i32
  }
  func.func @transform_4(%arg0: i32, %arg1: i32, %arg2: i32) -> (i32, i32) {
    %c0_i32 = arith.constant 0 : i32
    return %arg0, %arg1 : i32, i32
  }
}

</mosaic_0001>

<bundles_post_ra>
// kernel: tpu_custom_call.1
= control target key start
LH: loop header
LB: loop body
LE: loop exit
PB: predicated region body
PF: predicated region fallthrough
CT: control target
= control target key end

     0   :  { %s2502_s0 = inlined_call_operand.hbm [shape: f32[1,256], index: 0, kind: input, shape index: {}]   ;;  %s2503_s1 = inlined_call_operand.hbm [shape: f32[64,256], index: 1, kind: input, shape index: {}]   ;;  %s2504_s2 = inlined_call_operand.hbm [shape: bf16[256,768], index: 2, kind: input, shape index: {}]   ;;  %s2505_s3 = inlined_call_operand.hbm [shape: f32[1,768], index: 3, kind: input, shape index: {}]   ;;  %s2506_s4 = inlined_call_operand.hbm [shape: bf16[64,768], index: 4, kind: output, shape index: {}]  }
   0x1   :  { %2517 = sst [smem:[#allocation18_spill]] %s2502_s0 }
   0x2   :  { %2518 = sst [smem:[#allocation19_spill]] %s2504_s2 }
   0x3   :  { %9 = vsyncpa [#allocation5], 0 }
   0x4   :  { %10 = vsyncpa [#allocation8], 0 }
   0x5   :  { %11 = vsyncpa [#allocation6], 0 }
   0x6   :  { %13 = vsyncpa [#allocation6 + $0x1], 0  ;;  %s1999_s15 = smov 0   ;;  %s2001_s16 = smov 0  }
   0x7   :  { %s2003_s17 = smov 0   ;;  %s2005_s18 = smov 0  }
   0x8   :  { %s2007_s19 = smov 0   ;;  %s2009_s20 = smov 0  }
   0x9 LB: > { %s2030_s21 = sadd.s32 4294967295, %s1957_s20   ;;  %s1430_s22 = sadd.s32 4294967294, %s1957_s20   ;;  %s1957_s20 = sphi %s2009_s20, %s19_s20   ;;  %s1953_s19 = sphi %s2007_s19, %s2552_s19   ;;  %s1949_s18 = sphi %s2005_s18, %s2551_s18   ;;  %s1945_s17 = sphi %s2003_s17, %s2550_s17   ;;  %s1941_s16 = sphi %s2001_s16, %s2549_s16   ;;  %s1937_s15 = sphi %s1999_s15, %s2548_s15  }
   0xa   : > { %s34_s23 = sadd.s32 1, %s1953_s19  ;;  %s101_s24 = sadd.s32 1, %s1945_s17 }
   0xb   : > { %p36_p0 = scmp.ge.s32.totalorder %s34_s23, 2  ;;  %p108_p1 = scmp.ne.s32.totalorder %s1945_s17, %s1941_s16 }
   0xc   : > { %p109_p2 = scmp.eq.s32.totalorder %s1957_s20, 0  ;;  %p114_p3 = scmp.ne.s32.totalorder %s1941_s16, %s1937_s15 }
   0xd   : > { %s2554_s23 = smov (%p36_p0, %s34_s23), 0  ;;  %p2509_p5 = scmp.eq.s32.totalorder %s2030_s21, 0 }
   0xe   : > { %2519 = sst [smem:[#allocation16_spill]] %s2554_s23  ;;  %p2042_p4 = por %p109_p2, %p108_p1 }
   0xf   : > { %s97_s26 = ssub.s32 %s1953_s19, %s2554_s23  ;;  %p166_p6 = scmp.eq.s32.totalorder %s2030_s21, 1 }
  0x10   : > { %p99_p7 = scmp.eq.s32.totalorder %s97_s26, 0  ;;  %p2052_p8 = por %p2509_p5, %p114_p3 }
  0x11   : > { %p2056_p9 = por %p166_p6, %p108_p1  ;;  %p172_p10 = scmp.eq.s32.totalorder %s1430_s22, 1 }
  0x12   : > { %s2521_s27 = scalar_select %p2052_p8, 1, 0 }
  0x13   : > { %s2522_s28 = scalar_select %p2056_p9, 1, 0 }
  0x14   : > { %s2061_s29 = scalar_select %p99_p7, %s1945_s17, %s101_s24  }
  0x15   : > { %p2063_p11 = por %p172_p10, %p114_p3  ;;  %p1431_p12 = scmp.ge.s32.totalorder %s1957_s20, 1 }
  0x16   : > { %2523 = sst [smem:[#allocation17_spill]] %s2061_s29  ;;  %p179_p13 = scmp.lt.s32.totalorder %s1957_s20, 3 }
  0x17   : > { %s2524_s30 = scalar_select %p2063_p11, 1, 0 }
  0x18   : > { %p2070_p2 = pnand %p1431_p12, %p179_p13  ;;  %s1959_s6 = smov [#allocation4]  }
  0x19   : > { %s195_s7 = sshll.u32 %s1959_s6, 4  ;;  %p1605_p1 = scmp.lt.s32.totalorder %s1957_s20, 2  ;;  %s196_s7 = int_to_ptr.vmem [resolvable:$true] %s195_s7 }
  0x1a   : > { %s2525_s5 = scalar_select %p2070_p2, 1, 0 }
  0x1b   : > { %p1585_p6 = pneg %p2070_p2  ;;  %s225_s8 = sand.u32 1, %s1957_s20  }
  0x1c   : > { %p2080_p3 = pnand %p1605_p1, %p2042_p4  ;;  %s2508_s11 = sand.u32 1, %s1945_s17  }
  0x1d   : > { %p2086_p7 = pnand %p1585_p6, %p2509_p5  ;;  %s1566_s12 = smul.u32 384, %s2508_s11 }
  0x1e   : > { %s2526_s9 = scalar_select %p2080_p3, 1, 0 }
  0x1f   : > { %s1507_s13 = smul.u32 192, %s1953_s19  ;;  %s2528_s0 = sld [smem:[#allocation18_spill]] }
  0x20   : > { %p2514_p10 = pneg %p2086_p7 }
  0x25   : > { %s1751_s24 = scalar_lea.hbm %s2528_s0, 32 }
  0x26   : > { %p1752_p4 = scmp.ne.s32.totalorder %s2528_s0, %s1751_s24  ;;  %p1758_p1 = scmp.lt.u32.totalorder %s1751_s24, %s2528_s0 }
  0x28   : > { %p1754_p12 = pnand %p2514_p10, %p1752_p4 }
  0x2a   : > { %p1755_p13 = pneg %p1754_p12 }
  0x2c   : > { %p1760_p6 = pnand %p1758_p1, %p1755_p13 }
  0x2e   : > { %1763 = shalt.err (!%p1760_p6)
}
  0x2f   : > { %s1764_s11 = scalar_lea.vmem %s196_s7, 32  ;;  %p1772_p9 = scmp.lt.s32.totalorder %s196_s7, %s196_s7 }
  0x30   : > { %p1765_p0 = scmp.ne.s32.totalorder %s196_s7, %s1764_s11  ;;  %p1773_p8 = scmp.lt.s32.totalorder %s1764_s11, %s1764_s11 }
  0x32   : > { %p1767_p5 = pnand %p1765_p0, %p2514_p10  ;;  %p1774_p2 = por %p1773_p8, %p1772_p9 }
  0x34   : > { %p1768_p11 = pneg %p1767_p5 }
  0x36   : > { %p1775_p3 = pnand %p1774_p2, %p1768_p11 }
  0x38   : > { %1778 = shalt.err (!%p1775_p3)
}
  0x39   : > { %1588 = dma.hbm_to_vmem [thread:$0]  (!%p2086_p7), %s2528_s0, 32, %s196_s7, [#allocation5]  }
  0x3a   : > { %s2529_s2 = sld [smem:[#allocation19_spill]]  ;;  %s229_s11 = scalar_lea.vmem [#allocation9], %s1566_s12 }
  0x3b   : > { %s239_s26 = sshll.u32 %s229_s11, 4  ;;  %s2123_s6 = scalar_lea.sflag [#allocation5], %s225_s8  ;;  %s2121_s26 = int_to_ptr.vmem [resolvable:$true] %s239_s26 }
  0x3c   : > { %p2530_p8 = scmp.ne.s32.totalorder %s2526_s9, 0 }
  0x3e   : > { %p2515_p9 = pneg %p2530_p8 }
  0x40   : > { %s2119_s25 = scalar_lea.hbm %s2529_s2, %s1507_s13  ;;  %s1784_s14 = scalar_lea.hbm %s2529_s2, 12288 }
  0x41   : > { %s1779_s29 = scalar_lea.hbm %s2119_s25, 6144  ;;  %p1785_p2 = scmp.lt.u32.totalorder %s2119_s25, %s2529_s2 }
  0x42   : > { %p1780_p5 = scmp.ne.s32.totalorder %s2119_s25, %s1779_s29  ;;  %p1786_p3 = scmp.lt.u32.totalorder %s1784_s14, %s1779_s29 }
  0x43   : > { %p1788_p12 = scmp.lt.u32.totalorder %s1779_s29, %s2119_s25 }
  0x44   : > { %p1782_p11 = pnand %p2515_p9, %p1780_p5  ;;  %p1787_p4 = por %p1786_p3, %p1785_p2 }
  0x46   : > { %p1783_p0 = pneg %p1782_p11  ;;  %p1789_p13 = por %p1788_p12, %p1787_p4 }
  0x48   : > { %p1790_p1 = pnand %p1789_p13, %p1783_p0 }
  0x4a   : > { %1793 = shalt.err (!%p1790_p1)
}
  0x4b   : > { %s1794_s8 = scalar_lea.vmem %s2121_s26, 6144  ;;  %s1960_s12 = smov [#allocation9]  }
  0x4c   : > { %p1795_p6 = scmp.ne.s32.totalorder %s2121_s26, %s1794_s8  ;;  %s1799_s24 = sshll.u32 %s1960_s12, 4  ;;  %s1800_s24 = int_to_ptr.vmem [resolvable:$false] %s1799_s24 }
  0x4d   : > { %s1801_s11 = scalar_lea.vmem %s1800_s24, 12288  ;;  %p1802_p10 = scmp.lt.s32.totalorder %s2121_s26, %s1800_s24 }
  0x4e   : > { %p1797_p5 = pnand %p1795_p6, %p2515_p9  ;;  %p1803_p2 = scmp.lt.s32.totalorder %s1801_s11, %s1794_s8 }
  0x50   : > { %p1798_p11 = pneg %p1797_p5  ;;  %p1804_p3 = por %p1803_p2, %p1802_p10 }
  0x52   : > { %p1805_p4 = pnand %p1804_p3, %p1798_p11 }
  0x54   : > { %1808 = shalt.err (!%p1805_p4)
}
  0x55   : > { %s1961_s29 = smov 384   ;;  %s1962_s7 = smov 192  }
  0x56   : > { %s1963_s13 = smov 12   ;;  %s1964_s14 = smov [#allocation7]  }
  0x57   : > { %1595 = dma.hbm_to_vmem [thread:$0]  (!%p2530_p8), %s2119_s25, 6144, %s2121_s26, %s2123_s6, %s1961_s29, %s1962_s7, %s1963_s13  }
  0x58   : > { %s211_s22 = sshll.u32 %s1964_s14, 4  ;;  %s1809_s8 = scalar_lea.hbm %s2503_s1, 2048  ;;  %s212_s22 = int_to_ptr.vmem [resolvable:$true] %s211_s22 }
  0x59   : > { %p1810_p10 = scmp.ne.s32.totalorder %s2503_s1, %s1809_s8  ;;  %p2531_p0 = pneg %p2086_p7 }
  0x5a   : > { %p1816_p1 = scmp.lt.u32.totalorder %s1809_s8, %s2503_s1 }
  0x5b   : > { %p1812_p12 = pnand %p1810_p10, %p2531_p0 }
  0x5d   : > { %p1813_p13 = pneg %p1812_p12 }
  0x5f   : > { %p1818_p6 = pnand %p1816_p1, %p1813_p13 }
  0x61   : > { %1821 = shalt.err (!%p1818_p6)
}
  0x62   : > { %s1822_s25 = scalar_lea.vmem %s212_s22, 2048  ;;  %p2532_p11 = pmov %p2531_p0 }
  0x63   : > { %p1823_p5 = scmp.ne.s32.totalorder %s212_s22, %s1822_s25  ;;  %p1830_p4 = scmp.lt.s32.totalorder %s212_s22, %s212_s22 }
  0x64   : > { %p1831_p9 = scmp.lt.s32.totalorder %s1822_s25, %s1822_s25 }
  0x65   : > { %p1825_p2 = pnand %p1823_p5, %p2532_p11 }
  0x66   : > { %p1832_p8 = por %p1831_p9, %p1830_p4 }
  0x67   : > { %p1826_p3 = pneg %p1825_p2 }
  0x69   : > { %p1833_p0 = pnand %p1832_p8, %p1826_p3 }
  0x6b   : > { %1836 = shalt.err (!%p1833_p0)
}
  0x6c   : > { %s1965_s26 = smov 256   ;;  %s1966_s0 = smov 16  }
  0x6d   : > { %1591 = dma.hbm_to_vmem [thread:$0]  (!%p2086_p7), %s2503_s1, 2048, %s212_s22, [#allocation8], %s1965_s26, %s1965_s26, %s1966_s0  }
  0x6e   : > { %s2533_s7 = sand.u32 1, %s1945_s17   ;;  %s1508_s14 = smul.u32 48, %s1953_s19 }
  0x6f   : > { %s1567_s13 = smul.u32 3, %s2533_s7  ;;  %p2534_p9 = scmp.ne.s32.totalorder %s2526_s9, 0 }
  0x70   : > { %s2177_s8 = scalar_lea.hbm %s2505_s3, %s1508_s14  ;;  %s1842_s26 = scalar_lea.hbm %s2505_s3, 96 }
  0x71   : > { %s253_s24 = scalar_lea.vmem [#allocation10], %s1567_s13  ;;  %s1837_s10 = scalar_lea.hbm %s2177_s8, 48 }
  0x72   : > { %s261_s11 = sshll.u32 %s253_s24, 4  ;;  %p1838_p8 = scmp.ne.s32.totalorder %s2177_s8, %s1837_s10  ;;  %s262_s11 = int_to_ptr.vmem [resolvable:$true] %s261_s11 }
  0x73   : > { %p2535_p10 = pneg %p2534_p9  ;;  %p1843_p13 = scmp.lt.u32.totalorder %s2177_s8, %s2505_s3 }
  0x74   : > { %p1844_p1 = scmp.lt.u32.totalorder %s1842_s26, %s1837_s10  ;;  %p1846_p5 = scmp.lt.u32.totalorder %s1837_s10, %s2177_s8 }
  0x75   : > { %p1840_p7 = pnand %p1838_p8, %p2535_p10 }
  0x76   : > { %p1845_p6 = por %p1844_p1, %p1843_p13 }
  0x77   : > { %p1841_p12 = pneg %p1840_p7 }
  0x78   : > { %p1847_p11 = por %p1846_p5, %p1845_p6 }
  0x7a   : > { %p1848_p2 = pnand %p1847_p11, %p1841_p12 }
  0x7c   : > { %1851 = shalt.err (!%p1848_p2)
}
  0x7d   : > { %s1852_s29 = scalar_lea.vmem %s262_s11, 48  ;;  %p2536_p4 = pmov %p2535_p10 }
  0x7e   : > { %p1853_p3 = scmp.ne.s32.totalorder %s262_s11, %s1852_s29  ;;  %s1967_s7 = smov [#allocation10]  }
  0x7f   : > { %s1857_s13 = sshll.u32 %s1967_s7, 4  ;;  %s1858_s13 = int_to_ptr.vmem [resolvable:$false] %s1857_s13 }
  0x80   : > { %p1855_p0 = pnand %p1853_p3, %p2536_p4  ;;  %s1859_s14 = scalar_lea.vmem %s1858_s13, 96 }
  0x81   : > { %p1860_p10 = scmp.lt.s32.totalorder %s262_s11, %s1858_s13  ;;  %p1861_p7 = scmp.lt.s32.totalorder %s1859_s14, %s1852_s29 }
  0x82   : > { %p1856_p8 = pneg %p1855_p0 }
  0x83   : > { %p1862_p1 = por %p1861_p7, %p1860_p10 }
  0x85   : > { %p1863_p13 = pnand %p1862_p1, %p1856_p8 }
  0x87   : > { %1866 = shalt.err (!%p1863_p13)
}
  0x88   : > { %1598 = dma.hbm_to_vmem [thread:$0]  (!%p2534_p9), %s2177_s8, 48, %s262_s11, %s2123_s6  }
  0x89   : > { %p2537_p12 = scmp.ne.s32.totalorder %s2525_s5, 0 }
  0x8a   : > { %p2538_p6 = scmp.eq.s32.totalorder (!%p2537_p12), %s2030_s21, 0 }
  0x8b   : > { %270 = sbr.rel (%p2537_p12) target bundleno = 507 (0x1fb), region = 36 }
  0x92   : > { %1920 = dma.done.wait (%p2538_p6), [#allocation5], 32   ;;  %p2539_p5 = pmov %p2538_p6 }
  0x94   : > { %1922 = vsyncadd (%p2539_p5), [#allocation5], 4294967264  ;;  %p2540_p11 = pmov %p2539_p5 }
  0x95   : > { %p2541_p2 = pmov %p2539_p5 }
  0x96   : > { %1924 = dma.done.wait (%p2540_p11), [#allocation8], 2048  }
  0x97   : > { %1926 = vsyncadd (%p2541_p2), [#allocation8], 4294965248  ;;  %s280_s9 = sand.u32 1, %s2030_s21   ;;  %s2211_s6 = sand.u32 1, %s1941_s16  }
  0x98   : > { %s1568_s5 = smul.u32 384, %s2211_s6  ;;  %s281_s23 = scalar_lea.sflag [#allocation5], %s280_s9 }
  0x99   : > { %p2542_p9 = scmp.ne.s32.totalorder %s2521_s27, 0 }
  0x9a   : > { %s2214_s12 = scalar_lea.vmem [#allocation9], %s1568_s5 }
  0x9b   : > { %1928 = dma.done.wait (%p2542_p9), %s281_s23, 6192  }
  0x9c   : > { %1930 = vsyncadd (%p2542_p9), %s281_s23, 4294961104  ;;  %vm360_vm0 = vcmask 7168   ;;  %v452_v0 = vlaneseq  ;;  %v1968_v1 = vmov 0.0   ;;  %v2230_v3 = vld [vmem:[#allocation7] sm:$0xff]  ;;  %v370_v4 = vld [vmem:[#allocation7 + $0x8] sm:$0xff]  ;;  %s1569_s21 = smul.u32 3, %s2211_s6 }
  0x9d   : > { %361 = vst.msk [vmem:[#allocation3] sm:$0xff] %vm360_vm0, %v1968_v1  ;;  %362 = vst.msk [vmem:[#allocation3 + $0x8] sm:$0xff] %vm360_vm0, %v1968_v1  ;;  %v393_v5 = vmul.f32 %v2230_v3, %v2230_v3  ;;  %v394_v6 = vmul.f32 %v370_v4, %v370_v4  ;;  %v2234_v7 = vld [vmem:[#allocation4] sm:$0x3]  ;;  %v2236_v8 = vld [vmem:[#allocation7 + $0x10] sm:$0xff]  ;;  %s1570_s8 = smul.u32 96, %s2211_s6 }
  0x9e   : > { %363 = vst.msk [vmem:[#allocation3 + $0x10] sm:$0xff] %vm360_vm0, %v1968_v1  ;;  %364 = vst.msk [vmem:[#allocation3 + $0x18] sm:$0xff] %vm360_vm0, %v1968_v1  ;;  %v2228_v2 = vshrl.u32 %v452_v0, 7  ;;  %v372_v9 = vld [vmem:[#allocation7 + $0x18] sm:$0xff]  ;;  %v2238_v10 = vld [vmem:[#allocation7 + $0x20] sm:$0xff]  ;;  %v395_v11 = vmul.f32 %v2236_v8, %v2236_v8  ;;  %s293_s27 = scalar_lea.vmem [#allocation10], %s1569_s21 }
  0x9f   : > { %365 = vst.msk [vmem:[#allocation3 + $0x20] sm:$0xff] %vm360_vm0, %v1968_v1  ;;  %366 = vst.msk [vmem:[#allocation3 + $0x28] sm:$0xff] %vm360_vm0, %v1968_v1  ;;  %v396_v12 = vmul.f32 %v372_v9, %v372_v9  ;;  %v2242_v13 = vld [vmem:[#allocation7 + $0x28] sm:$0xff]  ;;  %v397_v14 = vmul.f32 %v2238_v10, %v2238_v10  ;;  %v2247_v16 = vld [vmem:[#allocation7 + $0x30] sm:$0xff]  ;;  %v409_v18 = vadd.f32 %v394_v6, %v393_v5  ;;  %s2402_s24 = scalar_lea.vmem [#allocation11], %s1570_s8  ;;  %s1525_s11 = smul.u32 192, %s1949_s18 }
  0xa0   : > { %367 = vst.msk [vmem:[#allocation3 + $0x30] sm:$0xff] %vm360_vm0, %v1968_v1  ;;  %368 = vst.msk [vmem:[#allocation3 + $0x38] sm:$0xff] %vm360_vm0, %v1968_v1  ;;  %v458_v15 = vsub.s32 1, %v2228_v2  ;;  %v2249_v17 = vld [vmem:[#allocation7 + $0x38] sm:$0xff]  ;;  %v398_v19 = vmul.f32 %v2242_v13, %v2242_v13  ;;  %v2253_v20 = vld [vmem:[#allocation7 + $0x40] sm:$0xff]  ;;  %v399_v22 = vmul.f32 %v2247_v16, %v2247_v16  ;;  %s1293_s10 = sshll.u32 %s2402_s24, 4  ;;  %s2451_s10 = int_to_ptr.vmem [resolvable:$true] %s1293_s10 }
  0xa1   : > { %v2255_v21 = vld [vmem:[#allocation7 + $0x48] sm:$0xff]  ;;  %v1671_v23 = vld [vmem:[%s2214_s12 + $0x4] ss:$12 sps:$4 sm:$0xff]   ;;  %410 = vadd.xlane.f32.xlu0 %v409_v18  ;;  %v412_v25 = vadd.f32 %v396_v12, %v395_v11  ;;  %v400_v27 = vmul.f32 %v2249_v17, %v2249_v17  ;;  %v2265_v29 = vld [vmem:[#allocation7 + $0x58] sm:$0xff]  ;;  %v401_v31 = vmul.f32 %v2253_v20, %v2253_v20  ;;  %s2449_s25 = scalar_lea.hbm %s2506_s4, %s1525_s11  ;;  %s1277_s26 = scalar_lea.sflag [#allocation6], %s2211_s6 }
  0xa2   : > { %v1673_v24 = vld [vmem:[%s2214_s12] ss:$12 sps:$4 sm:$0xff]   ;;  %v415_v26 = vadd.f32 %v398_v19, %v397_v14  ;;  %v2263_v28 = vld [vmem:[#allocation7 + $0x50] sm:$0xff]  ;;  %v2270_v30 = vrot.slane %v2234_v7, %v458_v15  ;;  %v402_v32 = vmul.f32 %v2255_v21, %v2255_v21  ;;  %830 = vmatprep.subr.bf16.mxu0 %v1671_v23  ;;  %v1674_v33 = vld [vmem:[%s2214_s12 + $0x1c] ss:$12 sps:$4 sm:$0xff]   ;;  %v404_v37 = vmul.f32 %v2265_v29, %v2265_v29  ;;  %s1867_s0 = scalar_lea.vmem %s2451_s10, 1536 }
  0xa3   : > { %v1676_v34 = vld [vmem:[%s2214_s12 + $0x18] ss:$12 sps:$4 sm:$0xff]   ;;  %v418_v35 = vadd.f32 %v400_v27, %v399_v22  ;;  %831 = vmatpush1.bf16.msra.mxu0 %v1673_v24  ;;  %v403_v36 = vmul.f32 %v2263_v28, %v2263_v28  ;;  %v2284_v39 = vld [vmem:[#allocation7 + $0x68] sm:$0xff]  ;;  %v1677_v40 = vld [vmem:[%s2214_s12 + $0x34] ss:$12 sps:$4 sm:$0xff]   ;;  %v454_v24 = vsub.s32 0, %v2228_v2  ;;  %p1868_p3 = scmp.ne.s32.totalorder %s2451_s10, %s1867_s0 }
  0xa4   : > { %416 = vadd.xlane.f32.xlu1 %v415_v26  ;;  %v2282_v38 = vld [vmem:[#allocation7 + $0x60] sm:$0xff]  ;;  %832 = vmatprep.subr.bf16.mxu0 %v1674_v33  ;;  %v421_v41 = vadd.f32 %v402_v32, %v401_v31  ;;  %v406_v43 = vmul.f32 %v2284_v39, %v2284_v39  ;;  %v2291_v44 = vld [vmem:[#allocation7 + $0x70] sm:$0xff]  ;;  %v2293_v45 = vld [vmem:[#allocation7 + $0x78] sm:$0xff]  ;;  %v463_v50 = vmul.f32 %v2270_v30, %v370_v4  ;;  %v1969_v27 = vmov 0   ;;  %p2543_p4 = scmp.ne.s32.totalorder %s2522_s28, 0  ;;  %s1970_s2 = smov [#allocation11]  }
  0xa5   : > { %413 = vadd.xlane.f32.xlu0 %v412_v25  ;;  %v405_v42 = vmul.f32 %v2282_v38, %v2282_v38  ;;  %v424_v46 = vadd.f32 %v404_v37, %v403_v36  ;;  %v407_v47 = vmul.f32 %v2291_v44, %v2291_v44  ;;  %v1679_v48 = vld [vmem:[%s2214_s12 + $0x30] ss:$12 sps:$4 sm:$0xff]   ;;  %v408_v49 = vmul.f32 %v2293_v45, %v2293_v45  ;;  %v1680_v52 = vld [vmem:[%s2214_s12 + $0x4c] ss:$12 sps:$4 sm:$0xff]   ;;  %v1682_v56 = vld [vmem:[%s2214_s12 + $0x48] ss:$12 sps:$4 sm:$0xff]  }
  0xa6   : > { %v465_v51 = vmul.f32 %v2270_v30, %v372_v9  ;;  %v1683_v57 = vld [vmem:[%s2214_s12 + $0x64] ss:$12 sps:$4 sm:$0xff]   ;;  %v1695_v58 = vld [vmem:[%s2214_s12 + $0xc8] ss:$12 sps:$4 sm:$0xff]   ;;  %v1685_v60 = vld [vmem:[%s2214_s12 + $0x60] ss:$12 sps:$4 sm:$0xff]   ;;  %1669 = vset.pattern.permute.xlu0 %v1969_v27  ;;  %1670 = vset.pattern.permute.xlu1 %v1969_v27  ;;  %p1869_p0 = pnand %p1868_p3, %p2543_p4 }
  0xa7   : > { %833 = vmatpush1.bf16.msra.mxu0 %v1676_v34  ;;  %v427_v53 = vadd.f32 %v406_v43, %v405_v42  ;;  %v430_v55 = vadd.f32 %v408_v49, %v407_v47  ;;  %v1696_v59 = vld [vmem:[%s2214_s12 + $0x8] ss:$12 sps:$4 sm:$0xff]   ;;  %1526 = vmatprep.subr.bf16.mxu1 %v1695_v58  ;;  %v1700_v62 = vld [vmem:[%s2214_s12 + $0xe0] ss:$12 sps:$4 sm:$0xff]   ;;  %v1688_v0 = vld [vmem:[%s2214_s12 + $0x78] ss:$12 sps:$4 sm:$0xff]   ;;  %v455_v34 = vrot.slane %v2234_v7, %v454_v24 }
  0xa8   : > { %419 = vadd.xlane.f32.xlu1 %v418_v35  ;;  %834 = vmatprep.subr.bf16.mxu0 %v1677_v40  ;;  %v479_v54 = vpack.c.bf16 %v465_v51, %v463_v50  ;;  %v1686_v61 = vld [vmem:[%s2214_s12 + $0x7c] ss:$12 sps:$4 sm:$0xff]   ;;  %v1701_v63 = vld [vmem:[%s2214_s12 + $0x20] ss:$12 sps:$4 sm:$0xff]   ;;  %v1705_v1 = vld [vmem:[%s2214_s12 + $0xf8] ss:$12 sps:$4 sm:$0xff]   ;;  %v467_v7 = vmul.f32 %v2270_v30, %v2242_v13  ;;  %p1870_p8 = pneg %p1869_p0 }
  0xa9   : > { %422 = vadd.xlane.f32.xlu0 %v421_v41  ;;  %1527 = vmatpush3.bf16.msra.mxu1 %v1696_v59  ;;  %v1689_v4 = vld [vmem:[%s2214_s12 + $0x94] ss:$12 sps:$4 sm:$0xff]   ;;  %v1706_v5 = vld [vmem:[%s2214_s12 + $0x38] ss:$12 sps:$4 sm:$0xff]   ;;  %v1691_v6 = vld [vmem:[%s2214_s12 + $0x90] ss:$12 sps:$4 sm:$0xff]   ;;  %v462_v41 = vmul.f32 %v455_v34, %v2230_v3  ;;  %v464_v42 = vmul.f32 %v455_v34, %v2236_v8  ;;  %v466_v13 = vmul.f32 %v455_v34, %v2238_v10 }
  0xaa   : > { %935 = vmatprep.mubr.bf16.mxu1 %v479_v54  ;;  %862 = vmatprep.mubr.bf16.mxu0 %v479_v54  ;;  %v1710_v9 = vld [vmem:[%s2214_s12 + $0x110] ss:$12 sps:$4 sm:$0xff]   ;;  %v1692_v11 = vld [vmem:[%s2214_s12 + $0xac] ss:$12 sps:$4 sm:$0xff]   ;;  %v1715_v14 = vld [vmem:[%s2214_s12 + $0x128] ss:$12 sps:$4 sm:$0xff]   ;;  %v472_v58 = vmul.f32 %v455_v34, %v2263_v28  ;;  %v476_v28 = vmul.f32 %v455_v34, %v2291_v44 }
  0xab   : > { %835 = vmatpush1.bf16.msra.mxu0 %v1679_v48  ;;  %1528 = vmatprep.subr.bf16.mxu1 %v1700_v62  ;;  %v1711_v12 = vld [vmem:[%s2214_s12 + $0x50] ss:$12 sps:$4 sm:$0xff]   ;;  %v1694_v18 = vld [vmem:[%s2214_s12 + $0xa8] ss:$12 sps:$4 sm:$0xff]   ;;  %v1720_v23 = vld [vmem:[%s2214_s12 + $0x140] ss:$12 sps:$4 sm:$0xff]   ;;  %v478_v49 = vpack.c.bf16 %v464_v42, %v462_v41 }
  0xac   : > { %425 = vadd.xlane.f32.xlu1 %v424_v46  ;;  %836 = vmatprep.subr.bf16.mxu0 %v1680_v52  ;;  %v1697_v19 = vld [vmem:[%s2214_s12 + $0xc4] ss:$12 sps:$4 sm:$0xff]   ;;  %v1716_v22 = vld [vmem:[%s2214_s12 + $0x68] ss:$12 sps:$4 sm:$0xff]   ;;  %v1699_v25 = vld [vmem:[%s2214_s12 + $0xc0] ss:$12 sps:$4 sm:$0xff]   ;;  %v469_v46 = vmul.f32 %v2270_v30, %v2249_v17  ;;  %v468_v17 = vmul.f32 %v455_v34, %v2247_v16  ;;  %v471_v52 = vmul.f32 %v2270_v30, %v2255_v21 }
  0xad   : > { %428 = vadd.xlane.f32.xlu0 %v427_v53  ;;  %1529 = vmatpush3.bf16.msra.mxu1 %v1701_v63  ;;  %v1702_v26 = vld [vmem:[%s2214_s12 + $0xdc] ss:$12 sps:$4 sm:$0xff]   ;;  %v1721_v31 = vld [vmem:[%s2214_s12 + $0x80] ss:$12 sps:$4 sm:$0xff]   ;;  %v1725_v32 = vld [vmem:[%s2214_s12 + $0x158] ss:$12 sps:$4 sm:$0xff]   ;;  %v473_v53 = vmul.f32 %v2270_v30, %v2265_v29  ;;  %v475_v21 = vmul.f32 %v2270_v30, %v2284_v39  ;;  %v477_v29 = vmul.f32 %v2270_v30, %v2293_v45 }
  0xae   : > { %1530 = vmatprep.subr.bf16.mxu1 %v1705_v1  ;;  %v1704_v33 = vld [vmem:[%s2214_s12 + $0xd8] ss:$12 sps:$4 sm:$0xff]   ;;  %v1707_v35 = vld [vmem:[%s2214_s12 + $0xf4] ss:$12 sps:$4 sm:$0xff]   ;;  %v1730_v37 = vld [vmem:[%s2214_s12 + $0x170] ss:$12 sps:$4 sm:$0xff]   ;;  %v481_v8 = vpack.c.bf16 %v469_v46, %v467_v7 }
  0xaf   : > { %837 = vmatpush1.bf16.msra.mxu0 %v1682_v56  ;;  %v1726_v36 = vld [vmem:[%s2214_s12 + $0x98] ss:$12 sps:$4 sm:$0xff]   ;;  %v1709_v40 = vld [vmem:[%s2214_s12 + $0xf0] ss:$12 sps:$4 sm:$0xff]   ;;  %v1714_v48 = vld [vmem:[%s2214_s12 + $0x108] ss:$12 sps:$4 sm:$0xff]   ;;  %v480_v56 = vpack.c.bf16 %v468_v17, %v466_v13  ;;  %v483_v10 = vpack.c.bf16 %v473_v53, %v471_v52  ;;  %v485_v62 = vpack.c.bf16 %v477_v29, %v475_v21 }
  0xb0   : > { %431 = vadd.xlane.f32.xlu1 %v430_v55  ;;  %838 = vmatprep.subr.bf16.mxu0 %v1683_v57  ;;  %v1712_v43 = vld [vmem:[%s2214_s12 + $0x10c] ss:$12 sps:$4 sm:$0xff]   ;;  %v1731_v47 = vld [vmem:[%s2214_s12 + $0xb0] ss:$12 sps:$4 sm:$0xff]   ;;  %v1727_v55 = vld [vmem:[%s2214_s12 + $0x154] ss:$12 sps:$4 sm:$0xff]   ;;  %v470_v57 = vmul.f32 %v455_v34, %v2253_v20  ;;  %v474_v20 = vmul.f32 %v455_v34, %v2282_v38 }
  0xb1   : > { %1531 = vmatpush3.bf16.msra.mxu1 %v1706_v5  ;;  %v1717_v3 = vld [vmem:[%s2214_s12 + $0x124] ss:$12 sps:$4 sm:$0xff]   ;;  %v1719_v50 = vld [vmem:[%s2214_s12 + $0x120] ss:$12 sps:$4 sm:$0xff]   ;;  %v1722_v51 = vld [vmem:[%s2214_s12 + $0x13c] ss:$12 sps:$4 sm:$0xff]  }
  0xb2   : > { %1532 = vmatprep.subr.bf16.mxu1 %v1710_v9  ;;  %v1724_v54 = vld [vmem:[%s2214_s12 + $0x138] ss:$12 sps:$4 sm:$0xff]   ;;  %v1729_v16 = vld [vmem:[%s2214_s12 + $0x150] ss:$12 sps:$4 sm:$0xff]   ;;  %v484_v63 = vpack.c.bf16 %v476_v28, %v474_v20  ;;  %s1871_s29 = sshll.u32 %s1970_s2, 4  ;;  %s1872_s29 = int_to_ptr.vmem [resolvable:$false] %s1871_s29 }
  0xb3   : > { %839 = vmatpush1.bf16.msra.mxu0 %v1685_v60  ;;  %v1732_v59 = vld [vmem:[%s2214_s12 + $0x16c] ss:$12 sps:$4 sm:$0xff]   ;;  %v1734_v60 = vld [vmem:[%s2214_s12 + $0x168] ss:$12 sps:$4 sm:$0xff]   ;;  %v385_v30 = vld [vmem:[#allocation3] sm:$0xff]  ;;  %s1873_s7 = scalar_lea.vmem %s1872_s29, 3072  ;;  %p1874_p10 = scmp.lt.s32.totalorder %s2451_s10, %s1872_s29 }
  0xb4   : > { %840 = vmatprep.subr.bf16.mxu0 %v1686_v61  ;;  %v482_v61 = vpack.c.bf16 %v472_v58, %v470_v57  ;;  %v387_v45 = vld [vmem:[#allocation3 + $0x10] sm:$0xff]  ;;  %v386_v1 = vld [vmem:[#allocation3 + $0x8] sm:$0xff]  ;;  %v388_v5 = vld [vmem:[#allocation3 + $0x18] sm:$0xff]  ;;  %p1875_p7 = scmp.lt.s32.totalorder %s1873_s7, %s1867_s0 }
  0xb5   : > { %1533 = vmatpush3.bf16.msra.mxu1 %v1711_v12 }
  0xb6   : > { %1534 = vmatprep.subr.bf16.mxu1 %v1715_v14  ;;  %p1876_p1 = por %p1875_p7, %p1874_p10 }
  0xb7   : > { %841 = vmatpush1.bf16.msra.mxu0 %v1688_v0 }
  0xb8   : > { %842 = vmatprep.subr.bf16.mxu0 %v1689_v4  ;;  %p1877_p13 = pnand %p1876_p1, %p1870_p8 }
  0xb9   : > { %1535 = vmatpush3.bf16.msra.mxu1 %v1716_v22 }
  0xba   : > { %1536 = vmatprep.subr.bf16.mxu1 %v1720_v23  ;;  %v391_v23 = vld [vmem:[#allocation3 + $0x30] sm:$0xff] }
  0xbb   : > { %843 = vmatpush1.bf16.msra.mxu0 %v1691_v6 }
  0xbc   : > { %844 = vmatprep.subr.bf16.mxu0 %v1692_v11  ;;  %v389_v11 = vld [vmem:[#allocation3 + $0x20] sm:$0xff] }
  0xbd   : > { %1537 = vmatpush3.bf16.msra.mxu1 %v1721_v31 }
  0xbe   : > { %1538 = vmatprep.subr.bf16.mxu1 %v1725_v32  ;;  %v392_v32 = vld [vmem:[#allocation3 + $0x38] sm:$0xff] }
  0xbf   : > { %845 = vmatpush1.bf16.msra.mxu0 %v1694_v18  ;;  %v390_v18 = vld [vmem:[#allocation3 + $0x28] sm:$0xff] }
  0xc0   : > { %846 = vmatprep.subr.bf16.mxu0 %v1697_v19 }
  0xc1   : > { %1539 = vmatpush3.bf16.msra.mxu1 %v1726_v36 }
  0xc2   : > { %1540 = vmatprep.subr.bf16.mxu1 %v1730_v37 }
  0xc3   : > { %847 = vmatpush1.bf16.msra.mxu0 %v1699_v25 }
  0xc4   : > { %848 = vmatprep.subr.bf16.mxu0 %v1702_v26 }
  0xc5   : > { %1541 = vmatpush3.bf16.msra.mxu1 %v1731_v47 }
  0xc7   : > { %849 = vmatpush1.bf16.msra.mxu0 %v1704_v33 }
  0xc8   : > { %850 = vmatprep.subr.bf16.mxu0 %v1707_v35  ;;  %936 = vmatmul.mubr.bf16.vlgmr.msra.gmra.mrb[0].mxu1 %v478_v49 }
  0xc9   : > { %943 = vmatprep.mubr.bf16.mxu1 %v481_v8 }
  0xcb   : > { %851 = vmatpush1.bf16.msra.mxu0 %v1709_v40 }
  0xcc   : > { %852 = vmatprep.subr.bf16.mxu0 %v1712_v43 }
  0xcf   : > { %853 = vmatpush1.bf16.msra.mxu0 %v1714_v48 }
  0xd0   : > { %854 = vmatprep.subr.bf16.mxu0 %v1717_v3  ;;  %944 = vmatmul.mubr.bf16.gmra.mrb[4].mxu1 %v480_v56 }
  0xd1   : > { %951 = vmatprep.mubr.bf16.mxu1 %v483_v10 }
  0xd3   : > { %855 = vmatpush1.bf16.msra.mxu0 %v1719_v50 }
  0xd4   : > { %856 = vmatprep.subr.bf16.mxu0 %v1722_v51 }
  0xd7   : > { %857 = vmatpush1.bf16.msra.mxu0 %v1724_v54 }
  0xd8   : > { %858 = vmatprep.subr.bf16.mxu0 %v1727_v55  ;;  %952 = vmatmul.mubr.bf16.gmra.mrb[8].mxu1 %v482_v61 }
  0xd9   : > { %959 = vmatprep.mubr.bf16.mxu1 %v485_v62 }
  0xdb   : > { %859 = vmatpush1.bf16.msra.mxu0 %v1729_v16 }
  0xdc   : > { %860 = vmatprep.subr.bf16.mxu0 %v1732_v59 }
  0xdf   : > { %861 = vmatpush1.bf16.msra.mxu0 %v1734_v60 }
  0xe0   : > { %960 = vmatmul.mubr.bf16.gmra.mrb[12].mxu1 %v484_v63 }
  0xe2   : > { %863 = vmatmul.mubr.bf16.vlgmr.msra.gmra.mrb[0].mxu0 %v478_v49 }
  0xe3   : > { %872 = vmatprep.mubr.bf16.mxu0 %v481_v8 }
  0xea   : > { %873 = vmatmul.mubr.bf16.gmra.mrb[4].mxu0 %v480_v56 }
  0xeb   : > { %882 = vmatprep.mubr.bf16.mxu0 %v483_v10 }
  0xf2   : > { %883 = vmatmul.mubr.bf16.gmra.mrb[8].mxu0 %v482_v61 }
  0xf3   : > { %892 = vmatprep.mubr.bf16.mxu0 %v485_v62 }
  0xfa   : > { %893 = vmatmul.mubr.bf16.gmra.mrb[12].mxu0 %v484_v63 }
 0x12e   : > { %v411_v39 = vpop.xlane.xlu0 %410 }
 0x12f   : > { %v433_v0 = vadd.f32 %v411_v39, %v385_v30 }
 0x131   : > { %v417_v4 = vpop.xlane.xlu1 %416  ;;  %442 = vst.msk [vmem:[#allocation3] sm:$0xff] %vm360_vm0, %v433_v0 }
 0x132   : > { %v435_v38 = vadd.f32 %v417_v4, %v387_v45  ;;  %v414_v44 = vpop.xlane.xlu0 %413 }
 0x133   : > { %v434_v6 = vadd.f32 %v414_v44, %v386_v1 }
 0x134   : > { %444 = vst.msk [vmem:[#allocation3 + $0x10] sm:$0xff] %vm360_vm0, %v435_v38 }
 0x135   : > { %v420_v9 = vpop.xlane.xlu1 %419  ;;  %443 = vst.msk [vmem:[#allocation3 + $0x8] sm:$0xff] %vm360_vm0, %v434_v6 }
 0x136   : > { %v436_v12 = vadd.f32 %v420_v9, %v388_v5  ;;  %v423_v14 = vpop.xlane.xlu0 %422 }
 0x137   : > { %v437_v19 = vadd.f32 %v423_v14, %v389_v11 }
 0x138   : > { %445 = vst.msk [vmem:[#allocation3 + $0x18] sm:$0xff] %vm360_vm0, %v436_v12  ;;  %v1019_v25 = vld [vmem:[#allocation3] sm:$0xff] }
 0x139   : > { %v426_v22 = vpop.xlane.xlu1 %425  ;;  %446 = vst.msk [vmem:[#allocation3 + $0x20] sm:$0xff] %vm360_vm0, %v437_v19  ;;  %v1027_v27 = vmul.f32 0.00390625, %v1019_v25 }
 0x13a   : > { %v438_v26 = vadd.f32 %v426_v22, %v390_v18  ;;  %v429_v31 = vpop.xlane.xlu0 %428 }
 0x13b   : > { %v1021_v33 = vld [vmem:[#allocation3 + $0x10] sm:$0xff]  ;;  %v439_v34 = vadd.f32 %v429_v31, %v391_v23  ;;  %v1035_v35 = vadd.f32 1e-06, %v1027_v27 }
 0x13c   : > { %447 = vst.msk [vmem:[#allocation3 + $0x28] sm:$0xff] %vm360_vm0, %v438_v26  ;;  %v1029_v36 = vmul.f32 0.00390625, %v1021_v33  ;;  %v1020_v40 = vld [vmem:[#allocation3 + $0x8] sm:$0xff] }
 0x13d   : > { %v432_v37 = vpop.xlane.xlu1 %431  ;;  %448 = vst.msk [vmem:[#allocation3 + $0x30] sm:$0xff] %vm360_vm0, %v439_v34  ;;  %1735 = vrsqrt.f32 %v1035_v35  ;;  %v1028_v42 = vmul.f32 0.00390625, %v1020_v40  ;;  %v1139_v40 = vld [vmem:[%s293_s27] sm:$0x7] }
 0x13e   : > { %v440_v41 = vadd.f32 %v432_v37, %v392_v32  ;;  %v1037_v46 = vadd.f32 1e-06, %v1029_v36  ;;  %v1151_v37 = vsub.s32 2, %v2228_v2 }
 0x13f   : > { %v1022_v43 = vld [vmem:[#allocation3 + $0x18] sm:$0xff]  ;;  %v1036_v7 = vadd.f32 1e-06, %v1028_v42  ;;  %v2390_v42 = vrot.slane %v1139_v40, %v454_v24 }
 0x140   : > { %449 = vst.msk [vmem:[#allocation3 + $0x38] sm:$0xff] %vm360_vm0, %v440_v41  ;;  %v1030_v47 = vmul.f32 0.00390625, %v1022_v43  ;;  %v1023_v48 = vld [vmem:[#allocation3 + $0x20] sm:$0xff]  ;;  %v2394_v43 = vrot.slane %v1139_v40, %v458_v15 }
 0x141   : > { %1737 = vrsqrt.f32 %v1036_v7  ;;  %v1031_v49 = vmul.f32 0.00390625, %v1023_v48  ;;  %v2396_v7 = vrot.slane %v1139_v40, %v1151_v37 }
 0x142   : > { %1739 = vrsqrt.f32 %v1037_v46  ;;  %v1038_v3 = vadd.f32 1e-06, %v1030_v47 }
 0x143   : > { %v1024_v8 = vld [vmem:[#allocation3 + $0x28] sm:$0xff]  ;;  %v1039_v13 = vadd.f32 1e-06, %v1031_v49 }
 0x144   : > { %1741 = vrsqrt.f32 %v1038_v3  ;;  %v1032_v17 = vmul.f32 0.00390625, %v1024_v8  ;;  %v1025_v51 = vld [vmem:[#allocation3 + $0x30] sm:$0xff] }
 0x145   : > { %1743 = vrsqrt.f32 %v1039_v13  ;;  %v1033_v54 = vmul.f32 0.00390625, %v1025_v51 }
 0x146   : > { %v1040_v53 = vadd.f32 1e-06, %v1032_v17 }
 0x147   : > { %v1736_v50 = vpop.eup %1735  ;;  %v1026_v55 = vld [vmem:[#allocation3 + $0x38] sm:$0xff]  ;;  %v1041_v10 = vadd.f32 1e-06, %v1033_v54 }
 0x148   : > { %1077 = vperm.xlu0 %1669, %v1736_v50   ;;  %1745 = vrsqrt.f32 %v1040_v53  ;;  %v1034_v16 = vmul.f32 0.00390625, %v1026_v55 }
 0x149   : > { %1747 = vrsqrt.f32 %v1041_v10 }
 0x14a   : > { %v1042_v58 = vadd.f32 1e-06, %v1034_v16 }
 0x14b   : > { %v1738_v52 = vpop.eup %1737 }
 0x14c   : > { %1082 = vperm.xlu1 %1670, %v1738_v52   ;;  %v1740_v56 = vpop.eup %1739  ;;  %1749 = vrsqrt.f32 %v1042_v58 }
 0x14e   : > { %v1742_v57 = vpop.eup %1741 }
 0x14f   : > { %v1744_v59 = vpop.eup %1743 }
 0x150   : > { %1087 = vperm.xlu1 %1670, %v1740_v56  }
 0x152   : > { %v1746_v21 = vpop.eup %1745 }
 0x153   : > { %v1748_v29 = vpop.eup %1747 }
 0x154   : > { %1092 = vperm.xlu1 %1670, %v1742_v57  }
 0x156   : > { %v1750_v60 = vpop.eup %1749 }
 0x158   : > { %1097 = vperm.xlu1 %1670, %v1744_v59  }
 0x15c   : > { %1102 = vperm.xlu1 %1670, %v1746_v21  }
 0x160   : > { %1107 = vperm.xlu1 %1670, %v1748_v29  }
 0x164   : > { %1112 = vperm.xlu1 %1670, %v1750_v60  }
 0x19b   : > { %v1542_v61 = vpop.f32.mrb[0].mxu1 }
 0x19c   : > { %v1543_v62 = vpop.f32.mrb[1].mxu1 }
 0x19d   : > { %v1544_v20 = vadd.f32 %v1543_v62, %v1542_v61  ;;  %v1545_v28 = vpop.f32.mrb[2].mxu1 }
 0x19e   : > { %v1546_v63 = vpop.f32.mrb[3].mxu1 }
 0x19f   : > { %v1547_v30 = vadd.f32 %v1546_v63, %v1545_v28 }
 0x1a3   : > { %v1548_v39 = vpop.f32.mrb[4].mxu1 }
 0x1a4   : > { %v1549_v45 = vpop.f32.mrb[5].mxu1 }
 0x1a5   : > { %v1550_v0 = vadd.f32 %v1549_v45, %v1548_v39  ;;  %v1551_v1 = vpop.f32.mrb[6].mxu1 }
 0x1a6   : > { %v1552_v4 = vpop.f32.mrb[7].mxu1 }
 0x1a7   : > { %v2376_v38 = vadd.f32 %v1552_v4, %v1551_v1 }
 0x1ab   : > { %v1554_v44 = vpop.f32.mrb[8].mxu1 }
 0x1ac   : > { %v1555_v5 = vpop.f32.mrb[9].mxu1 }
 0x1ad   : > { %v2378_v9 = vadd.f32 %v1555_v5, %v1554_v44  ;;  %v1557_v11 = vpop.f32.mrb[10].mxu1 }
 0x1ae   : > { %v1558_v14 = vpop.f32.mrb[11].mxu1 }
 0x1af   : > { %v2380_v19 = vadd.f32 %v1558_v14, %v1557_v11 }
 0x1b3   : > { %v1560_v23 = vpop.f32.mrb[12].mxu1 }
 0x1b4   : > { %v1561_v25 = vpop.f32.mrb[13].mxu1 }
 0x1b5   : > { %v864_v6 = vpop.f32.mrb[0].mxu0  ;;  %v2383_v27 = vadd.f32 %v1561_v25, %v1560_v23  ;;  %v1563_v31 = vpop.f32.mrb[14].mxu1 }
 0x1b6   : > { %v866_v12 = vpop.f32.mrb[1].mxu0  ;;  %v1564_v33 = vpop.f32.mrb[15].mxu1 }
 0x1b7   : > { %v868_v18 = vpop.f32.mrb[2].mxu0  ;;  %v2385_v35 = vadd.f32 %v1564_v33, %v1563_v31 }
 0x1b8   : > { %v870_v22 = vpop.f32.mrb[3].mxu0 }
 0x1bd   : > { %v874_v26 = vpop.f32.mrb[4].mxu0 }
 0x1be   : > { %v876_v32 = vpop.f32.mrb[5].mxu0 }
 0x1bf   : > { %v878_v34 = vpop.f32.mrb[6].mxu0 }
 0x1c0   : > { %v880_v36 = vpop.f32.mrb[7].mxu0 }
 0x1c5   : > { %v884_v41 = vpop.f32.mrb[8].mxu0 }
 0x1c6   : > { %v886_v46 = vpop.f32.mrb[9].mxu0 }
 0x1c7   : > { %v1078_v47 = vpop.permute.xlu0 %1077  ;;  %v888_v48 = vpop.f32.mrb[10].mxu0 }
 0x1c8   : > { %v1115_v3 = vmul.f32 %v1078_v47, %v864_v6  ;;  %v1116_v49 = vmul.f32 %v1078_v47, %v866_v12  ;;  %v1117_v8 = vmul.f32 %v1544_v20, %v1078_v47  ;;  %v890_v50 = vpop.f32.mrb[11].mxu0 }
 0x1ca   : > { %v1156_v13 = vadd.f32 %v2390_v42, %v1115_v3  ;;  %v1157_v17 = vadd.f32 %v2394_v43, %v1116_v49  ;;  %v1158_v24 = vadd.f32 %v2396_v7, %v1117_v8 }
 0x1cb   : > { %v1083_v51 = vpop.permute.xlu1 %1082 }
 0x1cc   : > { %v1509_v2 = vpack.c.bf16 %v1157_v17, %v1156_v13  ;;  %v1510_v15 = vpack.c.bf16 %v1158_v24, %v1158_v24  ;;  %v1118_v52 = vmul.f32 %v1083_v51, %v868_v18  ;;  %v1119_v53 = vmul.f32 %v1083_v51, %v870_v22 }
 0x1cd   : > { %v1120_v54 = vmul.f32 %v1547_v30, %v1083_v51  ;;  %v894_v55 = vpop.f32.mrb[12].mxu0 }
 0x1ce   : > { %1260 = vst [vmem:[%s2402_s24] sm:$0xff] %v1509_v2  ;;  %1261 = vst [vmem:[%s2402_s24 + $0x8] sm:$0xf] %v1510_v15  ;;  %v1159_v56 = vadd.f32 %v2390_v42, %v1118_v52  ;;  %v1160_v10 = vadd.f32 %v2394_v43, %v1119_v53  ;;  %v896_v16 = vpop.f32.mrb[13].mxu0 }
 0x1cf   : > { %v1161_v57 = vadd.f32 %v2396_v7, %v1120_v54  ;;  %v1088_v58 = vpop.permute.xlu1 %1087  ;;  %v898_v59 = vpop.f32.mrb[14].mxu0 }
 0x1d0   : > { %v1511_v21 = vpack.c.bf16 %v1160_v10, %v1159_v56  ;;  %v1121_v29 = vmul.f32 %v1088_v58, %v874_v26  ;;  %v1122_v60 = vmul.f32 %v1088_v58, %v876_v32  ;;  %v1123_v61 = vmul.f32 %v1550_v0, %v1088_v58  ;;  %v900_v62 = vpop.f32.mrb[15].mxu0 }
 0x1d1   : > { %v1512_v20 = vpack.c.bf16 %v1161_v57, %v1161_v57 }
 0x1d2   : > { %1262 = vst [vmem:[%s2402_s24 + $0xc] sm:$0xff] %v1511_v21  ;;  %v1162_v28 = vadd.f32 %v2390_v42, %v1121_v29  ;;  %v1163_v63 = vadd.f32 %v2394_v43, %v1122_v60  ;;  %v1164_v30 = vadd.f32 %v2396_v7, %v1123_v61 }
 0x1d3   : > { %1263 = vst [vmem:[%s2402_s24 + $0x14] sm:$0xf] %v1512_v20  ;;  %v1093_v39 = vpop.permute.xlu1 %1092 }
 0x1d4   : > { %v1513_v45 = vpack.c.bf16 %v1163_v63, %v1162_v28  ;;  %v1514_v1 = vpack.c.bf16 %v1164_v30, %v1164_v30  ;;  %v1124_v4 = vmul.f32 %v1093_v39, %v878_v34  ;;  %v1125_v44 = vmul.f32 %v1093_v39, %v880_v36 }
 0x1d5   : > { %v1126_v5 = vmul.f32 %v2376_v38, %v1093_v39 }
 0x1d6   : > { %1264 = vst [vmem:[%s2402_s24 + $0x18] sm:$0xff] %v1513_v45  ;;  %1265 = vst [vmem:[%s2402_s24 + $0x20] sm:$0xf] %v1514_v1  ;;  %v1165_v0 = vadd.f32 %v2390_v42, %v1124_v4  ;;  %v1166_v6 = vadd.f32 %v2394_v43, %v1125_v44 }
 0x1d7   : > { %v1167_v11 = vadd.f32 %v2396_v7, %v1126_v5  ;;  %v1098_v12 = vpop.permute.xlu1 %1097 }
 0x1d8   : > { %v1515_v14 = vpack.c.bf16 %v1166_v6, %v1165_v0  ;;  %v1127_v18 = vmul.f32 %v1098_v12, %v884_v41  ;;  %v1128_v22 = vmul.f32 %v1098_v12, %v886_v46  ;;  %v1129_v23 = vmul.f32 %v2378_v9, %v1098_v12 }
 0x1d9   : > { %v1516_v25 = vpack.c.bf16 %v1167_v11, %v1167_v11 }
 0x1da   : > { %1266 = vst [vmem:[%s2402_s24 + $0x24] sm:$0xff] %v1515_v14  ;;  %v1168_v38 = vadd.f32 %v2390_v42, %v1127_v18  ;;  %v1169_v26 = vadd.f32 %v2394_v43, %v1128_v22  ;;  %v1170_v31 = vadd.f32 %v2396_v7, %v1129_v23 }
 0x1db   : > { %1267 = vst [vmem:[%s2402_s24 + $0x2c] sm:$0xf] %v1516_v25  ;;  %v1103_v32 = vpop.permute.xlu1 %1102 }
 0x1dc   : > { %v1517_v33 = vpack.c.bf16 %v1169_v26, %v1168_v38  ;;  %v1518_v34 = vpack.c.bf16 %v1170_v31, %v1170_v31  ;;  %v1130_v36 = vmul.f32 %v1103_v32, %v888_v48  ;;  %v1131_v37 = vmul.f32 %v1103_v32, %v890_v50 }
 0x1dd   : > { %v1132_v40 = vmul.f32 %v2380_v19, %v1103_v32 }
 0x1de   : > { %1268 = vst [vmem:[%s2402_s24 + $0x30] sm:$0xff] %v1517_v33  ;;  %1269 = vst [vmem:[%s2402_s24 + $0x38] sm:$0xf] %v1518_v34  ;;  %v1171_v9 = vadd.f32 %v2390_v42, %v1130_v36  ;;  %v1172_v41 = vadd.f32 %v2394_v43, %v1131_v37 }
 0x1df   : > { %v1173_v46 = vadd.f32 %v2396_v7, %v1132_v40  ;;  %v1108_v47 = vpop.permute.xlu1 %1107 }
 0x1e0   : > { %v1519_v3 = vpack.c.bf16 %v1172_v41, %v1171_v9  ;;  %v1133_v49 = vmul.f32 %v1108_v47, %v894_v55  ;;  %v1134_v8 = vmul.f32 %v1108_v47, %v896_v16  ;;  %v1135_v48 = vmul.f32 %v2383_v27, %v1108_v47 }
 0x1e1   : > { %v1520_v19 = vpack.c.bf16 %v1173_v46, %v1173_v46 }
 0x1e2   : > { %1270 = vst [vmem:[%s2402_s24 + $0x3c] sm:$0xff] %v1519_v3  ;;  %v1174_v50 = vadd.f32 %v2390_v42, %v1133_v49  ;;  %v1175_v13 = vadd.f32 %v2394_v43, %v1134_v8  ;;  %v1176_v17 = vadd.f32 %v2396_v7, %v1135_v48 }
 0x1e3   : > { %1271 = vst [vmem:[%s2402_s24 + $0x44] sm:$0xf] %v1520_v19  ;;  %v1113_v24 = vpop.permute.xlu1 %1112 }
 0x1e4   : > { %v1521_v51 = vpack.c.bf16 %v1175_v13, %v1174_v50  ;;  %v1522_v2 = vpack.c.bf16 %v1176_v17, %v1176_v17  ;;  %v1136_v15 = vmul.f32 %v1113_v24, %v898_v59  ;;  %v1137_v52 = vmul.f32 %v1113_v24, %v900_v62 }
 0x1e5   : > { %v1138_v27 = vmul.f32 %v2385_v35, %v1113_v24 }
 0x1e6   : > { %1272 = vst [vmem:[%s2402_s24 + $0x48] sm:$0xff] %v1521_v51  ;;  %1273 = vst [vmem:[%s2402_s24 + $0x50] sm:$0xf] %v1522_v2  ;;  %v1177_v53 = vadd.f32 %v2390_v42, %v1136_v15  ;;  %v1178_v54 = vadd.f32 %v2394_v43, %v1137_v52 }
 0x1e7   : > { %v1179_v55 = vadd.f32 %v2396_v7, %v1138_v27 }
 0x1e8   : > { %v1523_v56 = vpack.c.bf16 %v1178_v54, %v1177_v53 }
 0x1e9   : > { %v1524_v35 = vpack.c.bf16 %v1179_v55, %v1179_v55 }
 0x1ea   : > { %1274 = vst [vmem:[%s2402_s24 + $0x54] sm:$0xff] %v1523_v56 }
 0x1eb   : > { %1275 = vst [vmem:[%s2402_s24 + $0x5c] sm:$0xf] %v1524_v35 }
 0x1ec   : > { %1880 = shalt.err (!%p1877_p13)
}
 0x1ed   : > { %s1881_s13 = scalar_lea.hbm %s2449_s25, 1536  ;;  %s1885_s5 = scalar_lea.hbm %s2506_s4, 3072 }
 0x1ee   : > { %p1882_p12 = scmp.ne.s32.totalorder %s2449_s25, %s1881_s13  ;;  %p1886_p11 = scmp.lt.u32.totalorder %s2449_s25, %s2506_s4 }
 0x1ef   : > { %p1887_p2 = scmp.lt.u32.totalorder %s1885_s5, %s1881_s13  ;;  %p1889_p3 = scmp.lt.u32.totalorder %s1881_s13, %s2449_s25 }
 0x1f0   : > { %p1883_p6 = pnand %p1882_p12, %p2543_p4 }
 0x1f1   : > { %p1888_p9 = por %p1887_p2, %p1886_p11 }
 0x1f2   : > { %p1884_p5 = pneg %p1883_p6 }
 0x1f3   : > { %p1890_p0 = por %p1889_p3, %p1888_p9 }
 0x1f5   : > { %p1891_p8 = pnand %p1890_p0, %p1884_p5 }
 0x1f7   : > { %1894 = shalt.err (!%p1891_p8)
}
 0x1f8   : > { %s1971_s21 = smov 192   ;;  %s1972_s27 = smov 384  }
 0x1f9   : > { %s1973_s8 = smov 12  }
 0x1fa   : > { %1583 = dma.vmem_to_hbm [thread:$0]  (%p2543_p4), %s2451_s10, 1536, %s2449_s25, %s1277_s26, %s1971_s21, %s1972_s27, %s1973_s8  }
 0x1fb PF: > { %s1308_s24 = sand.u32 1, %s1937_s15   ;;  %p2544_p10 = scmp.ne.s32.totalorder %s2524_s30, 0 }
 0x1fc   : > { %p2545_p7 = scmp.ge.s32.totalorder %s1957_s20, 2  ;;  %s1309_s11 = scalar_lea.sflag [#allocation6], %s1308_s24 }
 0x1fe   : > { %p1600_p1 = pnand %p2545_p7, %p2544_p10 }
 0x200   : > { %1932 = dma.done.wait (!%p1600_p1), %s1309_s11, 1536  }
 0x201   : > { %1934 = vsyncadd (!%p1600_p1), %s1309_s11, 4294965760  ;;  %s19_s20 = sadd.s32 1, %s1957_s20   ;;  %s2546_s18 = sld [smem:[#allocation17_spill]] }
 0x202   : > { %p16_p13 = scmp.ge.s32.totalorder %s19_s20, 4   ;;  %s2547_s28 = sld [smem:[#allocation16_spill]] }
 0x203   : > { %s2548_s15 = smov %s1941_s16  ;;  %s2549_s16 = smov %s1945_s17 }
 0x204   :  { %18 = sbr.rel (!%p16_p13) target bundleno = 9 (0x9), region = 109 }
 0x207   : > { %s2550_s17 = smov %s2546_s18  ;;  %s2551_s18 = smov %s1953_s19 }
 0x208   : > { %s2552_s19 = smov %s2547_s28 }
 0x20b   :  { %1314 = vsyncpa [#allocation5], 1 }
 0x20c   :  { %1316 = vsyncpa [#allocation5 + $0x1], 1 }
 0x20d   :  { %1317 = vsyncpa [#allocation8], 1 }
 0x20e   :  { %1318 = vsyncpa [#allocation6], 1 }
 0x20f   :  { %1320 = vsyncpa [#allocation6 + $0x1], 1 }

</bundles_post_ra>
